<compile_context>
chip_gen: v7x
topology: tpu7x:2x2x1
jax: 0.10.0
libtpu: 0.0.40
codegen_flags: <defaults>
</compile_context>

<pallas_src>
import jax
import jax.numpy as jnp
import numpy as np
from jax.experimental import pallas as pl
from jax.experimental.pallas import tpu as pltpu


def _dma_select_kernel(*refs):
  """Fused HBM->HBM copy of n selected feature maps.

  refs = (x_0..x_{n-1}, o_0..o_{n-1}, sem), where each x_i / o_i is a raw HBM
  ref (memory_space=pl.ANY) of identical shape/dtype and `sem` is a DMA
  semaphore array of shape (n,).  All DMAs are launched before any wait so
  they are concurrently in flight.
  """
  n = (len(refs) - 1) // 2
  in_refs, out_refs, sem = refs[:n], refs[n:2 * n], refs[-1]
  copies = [
      pltpu.make_async_copy(src, dst, sem.at[i])
      for i, (src, dst) in enumerate(zip(in_refs, out_refs))
  ]
  for c in copies:
    c.start()
  for c in copies:
    c.wait()


def feature_selector(feature_list, feature_idxes, *, materialize=False):
  """Pallas FeatureSelector.

  Default (`materialize=False`): zero-copy — returns the selected input arrays
  directly, matching the torch module's semantics (it returns the same tensor
  objects; no device work is required).

  `materialize=True`: returns freshly materialized copies produced by a single
  fused Pallas kernel using direct HBM->HBM DMA (no VMEM round trip).
  """
  # Static index selection (matches torch: plain Python list indexing).
  selected = [feature_list[i] for i in feature_idxes]
  if not selected or not materialize:
    return tuple(selected)

  n = len(selected)
  any_spec = pl.BlockSpec(memory_space=pl.ANY)

  outs = pl.pallas_call(
      _dma_select_kernel,
      out_shape=tuple(
          jax.ShapeDtypeStruct(x.shape, x.dtype) for x in selected),
      grid_spec=pltpu.PrefetchScalarGridSpec(
          num_scalar_prefetch=0,
          grid=(1,),
          in_specs=[any_spec] * n,
          out_specs=tuple([any_spec] * n),
          scratch_shapes=[pltpu.SemaphoreType.DMA((n,))],
      ),
      compiler_params=pltpu.CompilerParams(
          dimension_semantics=("arbitrary",)),
  )(*selected)

  if not isinstance(outs, (tuple, list)):
    outs = (outs,)
  return tuple(outs)


# ----------------------------- pure-JAX reference -----------------------------
def feature_selector_ref(feature_list, feature_idxes):
  return tuple(feature_list[i] for i in feature_idxes)


if __name__ == "__main__":
  key = jax.random.PRNGKey(0)

  batch = 2
  # A small SSD-like pyramid of feature maps (NCHW), different shapes per level.
  shapes = [
      (batch, 4, 16, 16),
      (batch, 8, 8, 8),
      (batch, 16, 4, 4),
      (batch, 32, 2, 2),
  ]
  feature_idxes = [0, 2, 3]

  keys = jax.random.split(key, len(shapes))
  feature_list = [
      jax.random.normal(k, s, jnp.float32) for k, s in zip(keys, shapes)
  ]

  ref = feature_selector_ref(feature_list, feature_idxes)

  # 1) Default zero-copy path: identical arrays returned, zero HBM traffic.
  zero_copy = feature_selector(feature_list, feature_idxes)
  assert isinstance(zero_copy, tuple) and len(zero_copy) == len(ref)
  for got, want in zip(zero_copy, ref):
    assert got is want

  # 2) Materialized path: exercises the fused HBM->HBM DMA Pallas kernel.
  materialized = feature_selector(feature_list, feature_idxes, materialize=True)
  jax.block_until_ready(materialized)
  assert isinstance(materialized, tuple) and len(materialized) == len(ref)
  for got, want in zip(materialized, ref):
    assert got.shape == want.shape, (got.shape, want.shape)
    assert got.dtype == want.dtype, (got.dtype, want.dtype)
    np.testing.assert_array_equal(np.asarray(got), np.asarray(want))

  print("KERNEL_OK")
</pallas_src>

<mosaic_0001>
module attributes {stable_mosaic.version = 11 : i64} {
  func.func @_dma_select_kernel(%arg0: i32, %arg1: memref<2x4x16x16xf32, #tpu.memory_space<any>>, %arg2: memref<2x16x4x4xf32, #tpu.memory_space<any>>, %arg3: memref<2x32x2x2xf32, #tpu.memory_space<any>>, %arg4: memref<2x4x16x16xf32, #tpu.memory_space<any>>, %arg5: memref<2x16x4x4xf32, #tpu.memory_space<any>>, %arg6: memref<2x32x2x2xf32, #tpu.memory_space<any>>, %arg7: memref<3x!tpu.dma_semaphore, #tpu.memory_space<semaphore_mem>>) attributes {dimension_semantics = [#tpu.dimension_semantics<arbitrary>], iteration_bounds = array<i64: 1>, scalar_prefetch = 0 : i64, scratch_operands = 1 : i64, tpu.core_type = #tpu.core_type<tc>, window_params = [{}, {}, {}, {}, {}, {}]} {
    %c0_i32 = arith.constant 0 : i32
    %0 = tpu.memref_slice %arg7[%c0_i32] : memref<3x!tpu.dma_semaphore, #tpu.memory_space<semaphore_mem>> -> memref<1x!tpu.dma_semaphore, #tpu.memory_space<semaphore_mem>>
    %1 = tpu.memref_squeeze %0 : memref<1x!tpu.dma_semaphore, #tpu.memory_space<semaphore_mem>> -> memref<!tpu.dma_semaphore, #tpu.memory_space<semaphore_mem>>
    tpu.enqueue_dma source(%arg1 : memref<2x4x16x16xf32, #tpu.memory_space<any>>) target(%arg4 : memref<2x4x16x16xf32, #tpu.memory_space<any>>) target_semaphore(%1 : memref<!tpu.dma_semaphore, #tpu.memory_space<semaphore_mem>>)
    %c1_i32 = arith.constant 1 : i32
    %2 = tpu.memref_slice %arg7[%c1_i32] : memref<3x!tpu.dma_semaphore, #tpu.memory_space<semaphore_mem>> -> memref<1x!tpu.dma_semaphore, #tpu.memory_space<semaphore_mem>>
    %3 = tpu.memref_squeeze %2 : memref<1x!tpu.dma_semaphore, #tpu.memory_space<semaphore_mem>> -> memref<!tpu.dma_semaphore, #tpu.memory_space<semaphore_mem>>
    tpu.enqueue_dma source(%arg2 : memref<2x16x4x4xf32, #tpu.memory_space<any>>) target(%arg5 : memref<2x16x4x4xf32, #tpu.memory_space<any>>) target_semaphore(%3 : memref<!tpu.dma_semaphore, #tpu.memory_space<semaphore_mem>>)
    %c2_i32 = arith.constant 2 : i32
    %4 = tpu.memref_slice %arg7[%c2_i32] : memref<3x!tpu.dma_semaphore, #tpu.memory_space<semaphore_mem>> -> memref<1x!tpu.dma_semaphore, #tpu.memory_space<semaphore_mem>>
    %5 = tpu.memref_squeeze %4 : memref<1x!tpu.dma_semaphore, #tpu.memory_space<semaphore_mem>> -> memref<!tpu.dma_semaphore, #tpu.memory_space<semaphore_mem>>
    tpu.enqueue_dma source(%arg3 : memref<2x32x2x2xf32, #tpu.memory_space<any>>) target(%arg6 : memref<2x32x2x2xf32, #tpu.memory_space<any>>) target_semaphore(%5 : memref<!tpu.dma_semaphore, #tpu.memory_space<semaphore_mem>>)
    %c0_i32_0 = arith.constant 0 : i32
    %6 = tpu.memref_slice %arg7[%c0_i32_0] : memref<3x!tpu.dma_semaphore, #tpu.memory_space<semaphore_mem>> -> memref<1x!tpu.dma_semaphore, #tpu.memory_space<semaphore_mem>>
    %7 = tpu.memref_squeeze %6 : memref<1x!tpu.dma_semaphore, #tpu.memory_space<semaphore_mem>> -> memref<!tpu.dma_semaphore, #tpu.memory_space<semaphore_mem>>
    tpu.wait_dma2 semaphore(%7 : memref<!tpu.dma_semaphore, #tpu.memory_space<semaphore_mem>>) src(%arg1 : memref<2x4x16x16xf32, #tpu.memory_space<any>>) dst(%arg4 : memref<2x4x16x16xf32, #tpu.memory_space<any>>)
    %c1_i32_1 = arith.constant 1 : i32
    %8 = tpu.memref_slice %arg7[%c1_i32_1] : memref<3x!tpu.dma_semaphore, #tpu.memory_space<semaphore_mem>> -> memref<1x!tpu.dma_semaphore, #tpu.memory_space<semaphore_mem>>
    %9 = tpu.memref_squeeze %8 : memref<1x!tpu.dma_semaphore, #tpu.memory_space<semaphore_mem>> -> memref<!tpu.dma_semaphore, #tpu.memory_space<semaphore_mem>>
    tpu.wait_dma2 semaphore(%9 : memref<!tpu.dma_semaphore, #tpu.memory_space<semaphore_mem>>) src(%arg2 : memref<2x16x4x4xf32, #tpu.memory_space<any>>) dst(%arg5 : memref<2x16x4x4xf32, #tpu.memory_space<any>>)
    %c2_i32_2 = arith.constant 2 : i32
    %10 = tpu.memref_slice %arg7[%c2_i32_2] : memref<3x!tpu.dma_semaphore, #tpu.memory_space<semaphore_mem>> -> memref<1x!tpu.dma_semaphore, #tpu.memory_space<semaphore_mem>>
    %11 = tpu.memref_squeeze %10 : memref<1x!tpu.dma_semaphore, #tpu.memory_space<semaphore_mem>> -> memref<!tpu.dma_semaphore, #tpu.memory_space<semaphore_mem>>
    tpu.wait_dma2 semaphore(%11 : memref<!tpu.dma_semaphore, #tpu.memory_space<semaphore_mem>>) src(%arg3 : memref<2x32x2x2xf32, #tpu.memory_space<any>>) dst(%arg6 : memref<2x32x2x2xf32, #tpu.memory_space<any>>)
    return
  }
}

</mosaic_0001>

<bundles_post_ra>
// kernel: tpu_custom_call.1
= control target key start
LH: loop header
LB: loop body
LE: loop exit
PB: predicated region body
PF: predicated region fallthrough
CT: control target
= control target key end

     0   :  { %s487_s0 = inlined_call_operand.vmem [shape: f32[2,4,16,16], index: 0, kind: input, shape index: {}]   ;;  %s488_s2 = inlined_call_operand.vmem [shape: f32[2,32,2,2], index: 2, kind: input, shape index: {}]   ;;  %s489_s3 = inlined_call_operand.hbm [shape: f32[2,4,16,16], index: 3, kind: output, shape index: {0}]   ;;  %s490_s5 = inlined_call_operand.vmem [shape: f32[2,32,2,2], index: 5, kind: output, shape index: {2}]   ;;  %s491_s1 = inlined_call_operand.vmem [shape: f32[2,16,4,4], index: 1, kind: input, shape index: {}]   ;;  %s492_s4 = inlined_call_operand.vmem [shape: f32[2,16,4,4], index: 4, kind: output, shape index: {1}]  }
   0x1   :  { %s18_s20 = sshll.u32 %s487_s0, 4  ;;  %v55_v0 = vld [vmem:[%s491_s1] sm:$0xff]  ;;  %v57_v1 = vld [vmem:[%s491_s1 + $0x8] sm:$0xff]  ;;  %v59_v2 = vld [vmem:[%s491_s1 + $0x10] sm:$0xff]  ;;  %s19_s20 = int_to_ptr.vmem [resolvable:$true] %s18_s20 }
   0x2   :  { %56 = vst [vmem:[%s492_s4] sm:$0xff] %v55_v0  ;;  %58 = vst [vmem:[%s492_s4 + $0x8] sm:$0xff] %v57_v1  ;;  %v61_v3 = vld [vmem:[%s491_s1 + $0x18] sm:$0xff]  ;;  %v63_v4 = vld [vmem:[%s491_s1 + $0x20] sm:$0xff]  ;;  %s222_s13 = scalar_lea.vmem %s19_s20, 2048  ;;  %p227_p1 = scmp.lt.s32.totalorder %s19_s20, %s19_s20 }
   0x3   :  { %60 = vst [vmem:[%s492_s4 + $0x10] sm:$0xff] %v59_v2  ;;  %v65_v5 = vld [vmem:[%s491_s1 + $0x28] sm:$0xff]  ;;  %p223_p0 = scmp.ne.s32.totalorder %s19_s20, %s222_s13  ;;  %p228_p2 = scmp.lt.s32.totalorder %s222_s13, %s222_s13 }
   0x5   :  { %p229_p3 = por %p228_p2, %p227_p1 }
   0x7   :  { %p230_p4 = pnand %p229_p3, %p223_p0 }
   0x9   :  { %233 = shalt.err (!%p230_p4)  }
   0xa   :  { %s234_s16 = scalar_lea.hbm %s489_s3, 2048 }
   0xb   :  { %p235_p5 = scmp.ne.s32.totalorder %s489_s3, %s234_s16  ;;  %p238_p6 = scmp.lt.u32.totalorder %s234_s16, %s489_s3 }
   0xd   :  { %p240_p7 = pnand %p238_p6, %p235_p5 }
   0xf   :  { %243 = shalt.err (!%p240_p7)  }
  0x10   :  { %21 = dma.vmem_to_hbm [thread:$0]  %s19_s20, 2048, %s489_s3, [#allocation2]  ;;  %62 = vst [vmem:[%s492_s4 + $0x18] sm:$0xff] %v61_v3  ;;  %64 = vst [vmem:[%s492_s4 + $0x20] sm:$0xff] %v63_v4  ;;  %v67_v6 = vld [vmem:[%s491_s1 + $0x30] sm:$0xff]  ;;  %v69_v7 = vld [vmem:[%s491_s1 + $0x38] sm:$0xff] }
  0x11   :  { %66 = vst [vmem:[%s492_s4 + $0x28] sm:$0xff] %v65_v5  ;;  %v71_v8 = vld [vmem:[%s491_s1 + $0x40] sm:$0xff]  ;;  %68 = vst [vmem:[%s492_s4 + $0x30] sm:$0xff] %v67_v6  ;;  %v73_v9 = vld [vmem:[%s491_s1 + $0x48] sm:$0xff] }
  0x12   :  { %70 = vst [vmem:[%s492_s4 + $0x38] sm:$0xff] %v69_v7  ;;  %72 = vst [vmem:[%s492_s4 + $0x40] sm:$0xff] %v71_v8  ;;  %v75_v10 = vld [vmem:[%s491_s1 + $0x50] sm:$0xff]  ;;  %v77_v11 = vld [vmem:[%s491_s1 + $0x58] sm:$0xff] }
  0x13   :  { %74 = vst [vmem:[%s492_s4 + $0x48] sm:$0xff] %v73_v9  ;;  %76 = vst [vmem:[%s492_s4 + $0x50] sm:$0xff] %v75_v10  ;;  %v79_v12 = vld [vmem:[%s491_s1 + $0x60] sm:$0xff]  ;;  %v81_v13 = vld [vmem:[%s491_s1 + $0x68] sm:$0xff] }
  0x14   :  { %78 = vst [vmem:[%s492_s4 + $0x58] sm:$0xff] %v77_v11  ;;  %v83_v14 = vld [vmem:[%s491_s1 + $0x70] sm:$0xff]  ;;  %80 = vst [vmem:[%s492_s4 + $0x60] sm:$0xff] %v79_v12  ;;  %v85_v15 = vld [vmem:[%s491_s1 + $0x78] sm:$0xff] }
  0x15   :  { %82 = vst [vmem:[%s492_s4 + $0x68] sm:$0xff] %v81_v13  ;;  %84 = vst [vmem:[%s492_s4 + $0x70] sm:$0xff] %v83_v14 }
  0x16   :  { %86 = vst [vmem:[%s492_s4 + $0x78] sm:$0xff] %v85_v15 }
  0x17   :  { %94 = vsyncadd [#allocation2 + $0x1], 2048  ;;  %v128_v16 = vld [vmem:[%s488_s2] sm:$0xff]  ;;  %v130_v17 = vld [vmem:[%s488_s2 + $0x8] sm:$0xff] }
  0x18   :  { %129 = vst [vmem:[%s490_s5] sm:$0xff] %v128_v16  ;;  %131 = vst [vmem:[%s490_s5 + $0x8] sm:$0xff] %v130_v17  ;;  %v132_v18 = vld [vmem:[%s488_s2 + $0x10] sm:$0xff]  ;;  %v134_v19 = vld [vmem:[%s488_s2 + $0x18] sm:$0xff] }
  0x19   :  { %v136_v20 = vld [vmem:[%s488_s2 + $0x20] sm:$0xff]  ;;  %133 = vst [vmem:[%s490_s5 + $0x10] sm:$0xff] %v132_v18  ;;  %135 = vst [vmem:[%s490_s5 + $0x18] sm:$0xff] %v134_v19  ;;  %v138_v21 = vld [vmem:[%s488_s2 + $0x28] sm:$0xff] }
  0x1a   :  { %137 = vst [vmem:[%s490_s5 + $0x20] sm:$0xff] %v136_v20  ;;  %v140_v22 = vld [vmem:[%s488_s2 + $0x30] sm:$0xff]  ;;  %v142_v23 = vld [vmem:[%s488_s2 + $0x38] sm:$0xff]  ;;  %139 = vst [vmem:[%s490_s5 + $0x28] sm:$0xff] %v138_v21 }
  0x1b   :  { %141 = vst [vmem:[%s490_s5 + $0x30] sm:$0xff] %v140_v22  ;;  %143 = vst [vmem:[%s490_s5 + $0x38] sm:$0xff] %v142_v23  ;;  %v144_v24 = vld [vmem:[%s488_s2 + $0x40] sm:$0xff]  ;;  %v146_v25 = vld [vmem:[%s488_s2 + $0x48] sm:$0xff] }
  0x1c   :  { %v148_v26 = vld [vmem:[%s488_s2 + $0x50] sm:$0xff]  ;;  %145 = vst [vmem:[%s490_s5 + $0x40] sm:$0xff] %v144_v24  ;;  %147 = vst [vmem:[%s490_s5 + $0x48] sm:$0xff] %v146_v25  ;;  %v150_v27 = vld [vmem:[%s488_s2 + $0x58] sm:$0xff] }
  0x1d   :  { %149 = vst [vmem:[%s490_s5 + $0x50] sm:$0xff] %v148_v26  ;;  %v152_v28 = vld [vmem:[%s488_s2 + $0x60] sm:$0xff]  ;;  %v154_v29 = vld [vmem:[%s488_s2 + $0x68] sm:$0xff]  ;;  %151 = vst [vmem:[%s490_s5 + $0x58] sm:$0xff] %v150_v27 }
  0x1e   :  { %153 = vst [vmem:[%s490_s5 + $0x60] sm:$0xff] %v152_v28  ;;  %155 = vst [vmem:[%s490_s5 + $0x68] sm:$0xff] %v154_v29  ;;  %v156_v30 = vld [vmem:[%s488_s2 + $0x70] sm:$0xff]  ;;  %v158_v31 = vld [vmem:[%s488_s2 + $0x78] sm:$0xff] }
  0x1f   :  { %157 = vst [vmem:[%s490_s5 + $0x70] sm:$0xff] %v156_v30  ;;  %159 = vst [vmem:[%s490_s5 + $0x78] sm:$0xff] %v158_v31 }
  0x20   :  { %167 = vsyncadd [#allocation2 + $0x2], 2048 }
  0x21   :  { %244 = dma.done.wait [#allocation2], 2048 }
  0x22   :  { %245 = vsyncadd [#allocation2], 4294965248 }
  0x23   :  { %246 = dma.done.wait [#allocation2 + $0x1], 2048 }
  0x24   :  { %247 = vsyncadd [#allocation2 + $0x1], 4294965248 }
  0x25   :  { %248 = dma.done.wait [#allocation2 + $0x2], 2048 }
  0x26   :  { %249 = vsyncadd [#allocation2 + $0x2], 4294965248 }
  0x27   :  { %183 = vsyncmov [#allocation2] }
  0x2a   :  { %s184_s22 = vpop.sfrf %183 }
  0x2b   :  { %p219_p8 = scmp.ne.s32.totalorder %s184_s22, 0 }
  0x2d   :  { %188 = shalt.err (%p219_p8)  }
  0x2e   :  { %190 = vsyncmov [#allocation2 + $0x1] }
  0x31   :  { %s191_s2 = vpop.sfrf %190 }
  0x32   :  { %p220_p9 = scmp.ne.s32.totalorder %s191_s2, 0 }
  0x34   :  { %195 = shalt.err (%p220_p9)  }
  0x35   :  { %197 = vsyncmov [#allocation2 + $0x2] }
  0x38   :  { %s198_s23 = vpop.sfrf %197 }
  0x39   :  { %p221_p10 = scmp.ne.s32.totalorder %s198_s23, 0 }
  0x3b   :  { %202 = shalt.err (%p221_p10)  }

</bundles_post_ra>
